<compile_context>
chip_gen: v7x
topology: tpu7x:2x2x1
jax: 0.10.0
libtpu: 0.0.40
codegen_flags: <defaults>
</compile_context>

<pallas_src>
import functools
import math

import jax
import jax.numpy as jnp
from jax import lax
from jax.experimental import pallas as pl
from jax.experimental.pallas import tpu as pltpu


def _round_up(x, m):
    return (x + m - 1) // m * m


def _choose_key_tile(n, key_tile=None):
    """Key-axis tile size: a multiple of 128 (lane dense), or the full N."""
    if key_tile is not None:
        key_tile = int(key_tile)
        if n % key_tile != 0:
            raise ValueError(f"key_tile={key_tile} must divide N={n}")
        return key_tile
    if n <= 512:
        return n                      # single block (== full dim, (8,128) rule ok)
    for tk in (512, 384, 256, 128):
        if n % tk == 0:
            return tk
    return n                          # fall back to a single un-tiled block


def _vmem_cap_bytes():
    try:
        return int(pltpu.get_tpu_info().vmem_capacity_bytes * 3 // 4)
    except Exception:
        return 48 * 1024 * 1024       # safe on v7x (64 MiB physical VMEM)


def _make_attn_kernel(indicator, inv_sqrt_d, dp, with_attn):
    """Kernel specialized on the static `indicator` branch / padded dim / outputs."""

    def kernel(x_full_ref, x_keys_ref, w_q_ref, b_q_ref, w_kv_ref, b_kv_ref, *refs):
        out_ref = refs[0]
        attn_ref = refs[1] if with_attn else None
        q_sc = refs[-1]

        ki = pl.program_id(0)

        @pl.when(ki == 0)
        def _():
            # Project q once; fold the 1/sqrt(D) scale in.  Valid for both branches:
            #   indicator==1: (q k^T) * s       == (q*s) k^T
            #   indicator==0: (1 - q k^T) * s   == s - (q*s) k^T
            q = jnp.dot(x_full_ref[...], w_q_ref[...],
                        preferred_element_type=jnp.float32) + b_q_ref[...]
            q_sc[...] = q * inv_sqrt_d
            out_ref[...] = jnp.zeros_like(out_ref)

        # Fused k/v projection for this key tile: (tk, Dp) @ (Dp, 2Dp).
        kv = jnp.dot(x_keys_ref[...], w_kv_ref[...],
                     preferred_element_type=jnp.float32) + b_kv_ref[...]
        k = kv[:, :dp]            # lane-aligned split: dp is a multiple of 128
        v = kv[:, dp:]

        # "NT" matmul: contract on the feature axis -> no in-kernel transpose of k.
        sim = lax.dot_general(q_sc[...], k, (((1,), (1,)), ((), ())),
                              preferred_element_type=jnp.float32)   # (N, tk)
        if indicator == 0:
            sim = inv_sqrt_d - sim

        # softmax over dim=0 (query axis) -- complete per key column in this tile.
        m = jnp.max(sim, axis=0, keepdims=True)
        e = jnp.exp(sim - m)
        colsum = jnp.sum(e, axis=0, keepdims=True)
        w = e * pl.reciprocal(colsum, approx=False)

        if attn_ref is not None:
            attn_ref[...] = w
        out_ref[...] += jnp.dot(w, v, preferred_element_type=jnp.float32)

    return kernel


def prepare_params(wq, bq, wk, bk, wv, bv):
    """Host-side, once-per-weight-set prep: pre-transpose the nn.Linear weights,
    pad the feature dim to a multiple of 128 (lane-dense), and fuse Wk.T|Wv.T."""
    d = wq.shape[0]
    dp = _round_up(d, 128)

    def pad_wt(w):
        wt = jnp.asarray(w, jnp.float32).T                    # (d, d)
        return jnp.pad(wt, ((0, dp - d), (0, dp - d)))        # (dp, dp), zero pad

    def pad_b(b):
        return jnp.pad(jnp.asarray(b, jnp.float32), (0, dp - d))

    w_q = pad_wt(wq)
    b_q = pad_b(bq).reshape(1, dp)
    w_kv = jnp.concatenate([pad_wt(wk), pad_wt(wv)], axis=1)  # (dp, 2dp)
    b_kv = jnp.concatenate([pad_b(bk), pad_b(bv)]).reshape(1, 2 * dp)
    return {"w_q": w_q, "b_q": b_q, "w_kv": w_kv, "b_kv": b_kv, "d": d}


@functools.partial(jax.jit,
                   static_argnames=("indicator", "return_attention", "d", "key_tile"))
def _forward(x, w_q, b_q, w_kv, b_kv, *, indicator, return_attention, d, key_tile):
    n = x.shape[0]
    dp = w_q.shape[0]
    x = x.astype(jnp.float32)
    if x.shape[1] != dp:                   # zero-pad features -> results unchanged
        x = jnp.pad(x, ((0, 0), (0, dp - x.shape[1])))

    tk = _choose_key_tile(n, key_tile)
    nk = n // tk
    inv_sqrt_d = 1.0 / math.sqrt(float(d))

    kernel = _make_attn_kernel(indicator, inv_sqrt_d, dp, return_attention)

    in_specs = [
        pl.BlockSpec((n, dp), lambda ki: (0, 0)),        # x (full, for q projection)
        pl.BlockSpec((tk, dp), lambda ki: (ki, 0)),      # x key-tile rows (for k/v)
        pl.BlockSpec((dp, dp), lambda ki: (0, 0)),       # Wq.T (padded)
        pl.BlockSpec((1, dp), lambda ki: (0, 0)),        # bq
        pl.BlockSpec((dp, 2 * dp), lambda ki: (0, 0)),   # [Wk.T | Wv.T]
        pl.BlockSpec((1, 2 * dp), lambda ki: (0, 0)),    # [bk | bv]
    ]
    out_block = pl.BlockSpec((n, dp), lambda ki: (0, 0))  # resident accumulator
    if return_attention:
        out_shape = (jax.ShapeDtypeStruct((n, dp), jnp.float32),
                     jax.ShapeDtypeStruct((n, n), jnp.float32))
        out_specs = (out_block, pl.BlockSpec((n, tk), lambda ki: (0, ki)))
    else:
        out_shape = jax.ShapeDtypeStruct((n, dp), jnp.float32)
        out_specs = out_block

    # Advisory cost estimate for XLA's scheduler around the custom call.
    flops = 2 * n * dp * 3 * dp + 4 * n * n * dp
    bytes_accessed = 4 * (2 * n * dp + 3 * dp * dp + 3 * dp + n * dp
                          + (n * n if return_attention else 0))

    # Rough per-step f32 VMEM budget: inputs (double-buffered), outputs, scratch,
    # kv / sim / e / w temporaries.
    est = 4 * (4 * n * dp
               + 2 * (3 * dp * dp + 3 * dp)
               + 2 * n * dp
               + (2 * n * tk if return_attention else 0)
               + n * dp
               + tk * 2 * dp
               + 3 * n * tk)
    vmem_limit = min(max(2 * est, 32 * 1024 * 1024), _vmem_cap_bytes())

    result = pl.pallas_call(
        kernel,
        grid=(nk,),
        in_specs=in_specs,
        out_shape=out_shape,
        out_specs=out_specs,
        scratch_shapes=[pltpu.VMEM((n, dp), jnp.float32)],   # q (scaled), resident
        compiler_params=pltpu.CompilerParams(
            dimension_semantics=("arbitrary",),              # key axis = contraction
            vmem_limit_bytes=vmem_limit),
        cost_estimate=pl.CostEstimate(flops=flops, transcendentals=n * n,
                                      bytes_accessed=bytes_accessed),
    )(x, x, w_q, b_q, w_kv, b_kv)

    if return_attention:
        out, attn = result
    else:
        out, attn = result, None
    if dp != d:
        out = out[:, :d]
    return out, attn


def single_head_self_attention(sent_mat, params, indicator, *,
                               return_attention=True, key_tile=None):
    """Forward pass of SingleHead_Self_Attention.

    `indicator` must be a Python int (1 or 0): a trace-time branch, exactly like
    the `if indicator == 1:` in the PyTorch module.  `params` comes from
    prepare_params() (call it once per weight set)."""
    return _forward(sent_mat, params["w_q"], params["b_q"],
                    params["w_kv"], params["b_kv"],
                    indicator=int(indicator),
                    return_attention=bool(return_attention),
                    d=params["d"], key_tile=key_tile)


def _reference(sent_mat, wq, bq, wk, bk, wv, bv, indicator):
    q = sent_mat @ wq.T + bq
    k = sent_mat @ wk.T + bk
    v = sent_mat @ wv.T + bv
    sim = q @ k.T
    if indicator == 0:
        sim = 1.0 - sim
    sim = sim / jnp.sqrt(jnp.float32(sent_mat.shape[1]))
    w = jax.nn.softmax(sim, axis=0)
    return w @ v, w


def _make_case(n, d, key):
    ks = jax.random.split(key, 7)
    x = jax.random.normal(ks[0], (n, d), dtype=jnp.float32)
    scale = 1.0 / math.sqrt(float(d))       # nn.Linear default init range
    mk_w = lambda k: jax.random.uniform(k, (d, d), jnp.float32, -scale, scale)
    mk_b = lambda k: jax.random.uniform(k, (d,), jnp.float32, -scale, scale)
    return x, (mk_w(ks[1]), mk_b(ks[2]), mk_w(ks[3]), mk_b(ks[4]),
               mk_w(ks[5]), mk_b(ks[6]))


if __name__ == "__main__":
    key0, key1 = jax.random.split(jax.random.PRNGKey(0), 2)
    ok = True

    # --- Demo shape: seq_len=8, in_dim=32 -------------------------------------
    x, weights = _make_case(8, 32, key0)
    params = prepare_params(*weights)       # host-side prep, once per weight set
    for indicator in (1, 0):
        out, attn = single_head_self_attention(x, params, indicator)
        out = jax.block_until_ready(out)
        attn = jax.block_until_ready(attn)
        ref_out, ref_attn = _reference(x, *weights, indicator)
        ok &= bool(jnp.allclose(out, ref_out, atol=1e-4, rtol=1e-4))
        ok &= bool(jnp.allclose(attn, ref_attn, atol=1e-4, rtol=1e-4))

    # Fast path: skip the NxN attention-weight writeback.
    out_only, none_attn = single_head_self_attention(x, params, 1,
                                                     return_attention=False)
    out_only = jax.block_until_ready(out_only)
    ref_out, _ = _reference(x, *weights, 1)
    ok &= none_attn is None
    ok &= bool(jnp.allclose(out_only, ref_out, atol=1e-4, rtol=1e-4))

    # --- Exercise the key-column grid (2 tiles of 128) -------------------------
    x2, weights2 = _make_case(256, 32, key1)
    params2 = prepare_params(*weights2)
    out2, attn2 = single_head_self_attention(x2, params2, 0, key_tile=128)
    out2 = jax.block_until_ready(out2)
    attn2 = jax.block_until_ready(attn2)
    ref_out2, ref_attn2 = _reference(x2, *weights2, 0)
    ok &= bool(jnp.allclose(out2, ref_out2, atol=1e-4, rtol=1e-4))
    ok &= bool(jnp.allclose(attn2, ref_attn2, atol=1e-4, rtol=1e-4))

    if ok:
        print("KERNEL_OK")
</pallas_src>

<mosaic_0001>
module attributes {stable_mosaic.version = 11 : i64} {
  func.func @kernel(%arg0: i32, %arg1: memref<8x128xf32, #tpu.memory_space<vmem>>, %arg2: memref<8x128xf32, #tpu.memory_space<vmem>>, %arg3: memref<128x128xf32, #tpu.memory_space<vmem>>, %arg4: memref<1x128xf32, #tpu.memory_space<vmem>>, %arg5: memref<128x256xf32, #tpu.memory_space<vmem>>, %arg6: memref<1x256xf32, #tpu.memory_space<vmem>>, %arg7: memref<8x128xf32, #tpu.memory_space<vmem>>, %arg8: memref<8x8xf32, #tpu.memory_space<vmem>>, %arg9: memref<8x128xf32, #tpu.memory_space<vmem>>) attributes {dimension_semantics = [#tpu.dimension_semantics<arbitrary>], iteration_bounds = array<i64: 1>, scalar_prefetch = 0 : i64, scratch_operands = 1 : i64, tpu.core_type = #tpu.core_type<tc>, window_params = [{pipeline_mode = #tpu.pipeline_mode<synchronous>, transform_indices = @transform_0, window_bounds = array<i64: 8, 128>}, {transform_indices = @transform_1, window_bounds = array<i64: 8, 128>}, {pipeline_mode = #tpu.pipeline_mode<synchronous>, transform_indices = @transform_2, window_bounds = array<i64: 128, 128>}, {pipeline_mode = #tpu.pipeline_mode<synchronous>, transform_indices = @transform_3, window_bounds = array<i64: 1, 128>}, {pipeline_mode = #tpu.pipeline_mode<synchronous>, transform_indices = @transform_4, window_bounds = array<i64: 128, 256>}, {pipeline_mode = #tpu.pipeline_mode<synchronous>, transform_indices = @transform_5, window_bounds = array<i64: 1, 256>}, {pipeline_mode = #tpu.pipeline_mode<synchronous>, transform_indices = @transform_6, window_bounds = array<i64: 8, 128>}, {transform_indices = @transform_7, window_bounds = array<i64: 8, 8>}]} {
    %c0_i32 = arith.constant 0 : i32
    %0 = arith.cmpi eq, %arg0, %c0_i32 : i32
    %1 = arith.extui %0 : i1 to i32
    %c0_i32_0 = arith.constant 0 : i32
    %2 = arith.cmpi ne, %1, %c0_i32_0 : i32
    scf.if %2 {
      %c0_18 = arith.constant 0 : index
      %c0_19 = arith.constant 0 : index
      %28 = vector.load %arg1[%c0_18, %c0_19] : memref<8x128xf32, #tpu.memory_space<vmem>>, vector<8x128xf32>
      %c0_20 = arith.constant 0 : index
      %c0_21 = arith.constant 0 : index
      %29 = vector.load %arg3[%c0_20, %c0_21] : memref<128x128xf32, #tpu.memory_space<vmem>>, vector<128x128xf32>
      %cst_22 = arith.constant dense<0.000000e+00> : vector<8x128xf32>
      %30 = tpu.matmul %28, %29, %cst_22 {dimension_numbers = #tpu.dot_dimension_numbers<[1], [0], [0], [1], [0, 0, 1, 1], [], []>} : vector<8x128xf32>, vector<128x128xf32>, vector<8x128xf32> -> vector<8x128xf32>
      %c0_23 = arith.constant 0 : index
      %c0_24 = arith.constant 0 : index
      %31 = vector.load %arg4[%c0_23, %c0_24] : memref<1x128xf32, #tpu.memory_space<vmem>>, vector<1x128xf32>
      %32 = vector.broadcast %31 : vector<1x128xf32> to vector<8x128xf32>
      %33 = arith.addf %30, %32 : vector<8x128xf32>
      %cst_25 = arith.constant 0.176776692 : f32
      %34 = vector.broadcast %cst_25 : f32 to vector<8x128xf32>
      %35 = arith.mulf %33, %34 : vector<8x128xf32>
      %c0_26 = arith.constant 0 : index
      %c0_27 = arith.constant 0 : index
      %36 = vector.load %arg9[%c0_26, %c0_27] : memref<8x128xf32, #tpu.memory_space<vmem>>, vector<8x128xf32>
      tpu.vector_store %arg9[%c0_26, %c0_27], %35 {strides = array<i32>} : memref<8x128xf32, #tpu.memory_space<vmem>>, vector<8x128xf32>,
      %cst_28 = arith.constant 0.000000e+00 : f32
      %37 = vector.broadcast %cst_28 : f32 to vector<8x128xf32>
      %c0_29 = arith.constant 0 : index
      %c0_30 = arith.constant 0 : index
      %38 = vector.load %arg7[%c0_29, %c0_30] : memref<8x128xf32, #tpu.memory_space<vmem>>, vector<8x128xf32>
      tpu.vector_store %arg7[%c0_29, %c0_30], %37 {strides = array<i32>} : memref<8x128xf32, #tpu.memory_space<vmem>>, vector<8x128xf32>,
    } else {
    }
    %c0 = arith.constant 0 : index
    %c0_1 = arith.constant 0 : index
    %3 = vector.load %arg2[%c0, %c0_1] : memref<8x128xf32, #tpu.memory_space<vmem>>, vector<8x128xf32>
    %c0_2 = arith.constant 0 : index
    %c0_3 = arith.constant 0 : index
    %4 = vector.load %arg5[%c0_2, %c0_3] : memref<128x256xf32, #tpu.memory_space<vmem>>, vector<128x256xf32>
    %cst = arith.constant dense<0.000000e+00> : vector<8x256xf32>
    %5 = tpu.matmul %3, %4, %cst {dimension_numbers = #tpu.dot_dimension_numbers<[1], [0], [0], [1], [0, 0, 1, 1], [], []>} : vector<8x128xf32>, vector<128x256xf32>, vector<8x256xf32> -> vector<8x256xf32>
    %c0_4 = arith.constant 0 : index
    %c0_5 = arith.constant 0 : index
    %6 = vector.load %arg6[%c0_4, %c0_5] : memref<1x256xf32, #tpu.memory_space<vmem>>, vector<1x256xf32>
    %7 = vector.broadcast %6 : vector<1x256xf32> to vector<8x256xf32>
    %8 = arith.addf %5, %7 : vector<8x256xf32>
    %9 = vector.extract_strided_slice %8 {offsets = [0, 0], sizes = [8, 128], strides = [1, 1]} : vector<8x256xf32> to vector<8x128xf32>
    %10 = vector.extract_strided_slice %8 {offsets = [0, 128], sizes = [8, 128], strides = [1, 1]} : vector<8x256xf32> to vector<8x128xf32>
    %c0_6 = arith.constant 0 : index
    %c0_7 = arith.constant 0 : index
    %11 = vector.load %arg9[%c0_6, %c0_7] : memref<8x128xf32, #tpu.memory_space<vmem>>, vector<8x128xf32>
    %cst_8 = arith.constant dense<0.000000e+00> : vector<8x8xf32>
    %12 = tpu.matmul %11, %9, %cst_8 {dimension_numbers = #tpu.dot_dimension_numbers<[1], [1], [0], [0], [0, 0, 1, 0], [], []>} : vector<8x128xf32>, vector<8x128xf32>, vector<8x8xf32> -> vector<8x8xf32>
    %cst_9 = arith.constant dense<0xFF800000> : vector<8xf32>
    %13 = vector.multi_reduction <maximumf>, %12, %cst_9 [0] : vector<8x8xf32> to vector<8xf32>
    %14 = vector.shape_cast %13 : vector<8xf32> to vector<1x8xf32>
    %15 = vector.broadcast %14 : vector<1x8xf32> to vector<8x8xf32>
    %16 = arith.subf %12, %15 : vector<8x8xf32>
    %17 = math.exp %16 : vector<8x8xf32>
    %cst_10 = arith.constant dense<0.000000e+00> : vector<8xf32>
    %18 = vector.multi_reduction <add>, %17, %cst_10 [0] : vector<8x8xf32> to vector<8xf32>
    %19 = vector.shape_cast %18 : vector<8xf32> to vector<1x8xf32>
    %20 = tpu.reciprocal %19 : vector<1x8xf32> -> vector<1x8xf32>
    %21 = vector.broadcast %20 : vector<1x8xf32> to vector<8x8xf32>
    %22 = arith.mulf %17, %21 : vector<8x8xf32>
    %c0_11 = arith.constant 0 : index
    %c0_12 = arith.constant 0 : index
    %23 = vector.load %arg8[%c0_11, %c0_12] : memref<8x8xf32, #tpu.memory_space<vmem>>, vector<8x8xf32>
    tpu.vector_store %arg8[%c0_11, %c0_12], %22 {strides = array<i32>} : memref<8x8xf32, #tpu.memory_space<vmem>>, vector<8x8xf32>,
    %c0_13 = arith.constant 0 : index
    %c0_14 = arith.constant 0 : index
    %24 = vector.load %arg7[%c0_13, %c0_14] : memref<8x128xf32, #tpu.memory_space<vmem>>, vector<8x128xf32>
    %cst_15 = arith.constant dense<0.000000e+00> : vector<8x128xf32>
    %25 = tpu.matmul %22, %10, %cst_15 {dimension_numbers = #tpu.dot_dimension_numbers<[1], [0], [0], [1], [0, 0, 1, 1], [], []>} : vector<8x8xf32>, vector<8x128xf32>, vector<8x128xf32> -> vector<8x128xf32>
    %26 = arith.addf %24, %25 : vector<8x128xf32>
    %c0_16 = arith.constant 0 : index
    %c0_17 = arith.constant 0 : index
    %27 = vector.load %arg7[%c0_16, %c0_17] : memref<8x128xf32, #tpu.memory_space<vmem>>, vector<8x128xf32>
    tpu.vector_store %arg7[%c0_16, %c0_17], %26 {strides = array<i32>} : memref<8x128xf32, #tpu.memory_space<vmem>>, vector<8x128xf32>,
    return
  }
  func.func @transform_0(%arg0: i32) -> (i32, i32) {
    %c0_i32 = arith.constant 0 : i32
    %c0_i32_0 = arith.constant 0 : i32
    %c0_i32_1 = arith.constant 0 : i32
    return %c0_i32, %c0_i32_0 : i32, i32
  }
  func.func @transform_1(%arg0: i32) -> (i32, i32) {
    %c0_i32 = arith.constant 0 : i32
    %c0_i32_0 = arith.constant 0 : i32
    return %arg0, %c0_i32 : i32, i32
  }
  func.func @transform_2(%arg0: i32) -> (i32, i32) {
    %c0_i32 = arith.constant 0 : i32
    %c0_i32_0 = arith.constant 0 : i32
    %c0_i32_1 = arith.constant 0 : i32
    return %c0_i32, %c0_i32_0 : i32, i32
  }
  func.func @transform_3(%arg0: i32) -> (i32, i32) {
    %c0_i32 = arith.constant 0 : i32
    %c0_i32_0 = arith.constant 0 : i32
    %c0_i32_1 = arith.constant 0 : i32
    return %c0_i32, %c0_i32_0 : i32, i32
  }
  func.func @transform_4(%arg0: i32) -> (i32, i32) {
    %c0_i32 = arith.constant 0 : i32
    %c0_i32_0 = arith.constant 0 : i32
    %c0_i32_1 = arith.constant 0 : i32
    return %c0_i32, %c0_i32_0 : i32, i32
  }
  func.func @transform_5(%arg0: i32) -> (i32, i32) {
    %c0_i32 = arith.constant 0 : i32
    %c0_i32_0 = arith.constant 0 : i32
    %c0_i32_1 = arith.constant 0 : i32
    return %c0_i32, %c0_i32_0 : i32, i32
  }
  func.func @transform_6(%arg0: i32) -> (i32, i32) {
    %c0_i32 = arith.constant 0 : i32
    %c0_i32_0 = arith.constant 0 : i32
    %c0_i32_1 = arith.constant 0 : i32
    return %c0_i32, %c0_i32_0 : i32, i32
  }
  func.func @transform_7(%arg0: i32) -> (i32, i32) {
    %c0_i32 = arith.constant 0 : i32
    %c0_i32_0 = arith.constant 0 : i32
    return %c0_i32, %arg0 : i32, i32
  }
}

</mosaic_0001>

<bundles_post_ra>
// kernel: _forward.1
= control target key start
LH: loop header
LB: loop body
LE: loop exit
PB: predicated region body
PF: predicated region fallthrough
CT: control target
= control target key end

     0   :  { %13 = vsyncpa [#allocation4], 0  ;;  %s837_s0 = inlined_call_operand.vmem [shape: f32[8,128], index: 0, kind: input, shape index: {}, may-alias: {0,1}]   ;;  %s838_s1 = inlined_call_operand.vmem [shape: f32[8,128], index: 1, kind: input, shape index: {}, may-alias: {0,1}]   ;;  %s839_s2 = inlined_call_operand.hbm [shape: f32[128,128], index: 2, kind: input, shape index: {}]   ;;  %s840_s3 = inlined_call_operand.vmem [shape: f32[1,128], index: 3, kind: input, shape index: {}]   ;;  %s841_s4 = inlined_call_operand.hbm [shape: f32[128,256], index: 4, kind: input, shape index: {}]   ;;  %s842_s5 = inlined_call_operand.vmem [shape: f32[1,256], index: 5, kind: input, shape index: {}]   ;;  %s843_s6 = inlined_call_operand.hbm [shape: f32[8,128], index: 6, kind: output, shape index: {0}]   ;;  %s844_s7 = inlined_call_operand.hbm [shape: f32[8,8], index: 7, kind: output, shape index: {1}]  }
   0x1   :  { %14 = vsyncpa [#allocation7], 0 }
   0x2   :  { %15 = vsyncpa [#allocation5], 0 }
   0x3   :  { %16 = vsyncpa [#allocation10], 0  ;;  %s705_s24 = smov [#allocation3]   ;;  %s609_s28 = scalar_lea.hbm %s839_s2, 2048 }
   0x4   :  { %s26_s25 = sshll.u32 %s705_s24, 4  ;;  %p610_p0 = scmp.ne.s32.totalorder %s839_s2, %s609_s28  ;;  %s27_s25 = int_to_ptr.vmem [resolvable:$true] %s26_s25 }
   0x5   :  { %p613_p1 = scmp.lt.u32.totalorder %s609_s28, %s839_s2 }
   0x7   :  { %p615_p2 = pnand %p613_p1, %p610_p0 }
   0x9   :  { %618 = shalt.err (!%p615_p2)
}
   0xa   :  { %s619_s10 = scalar_lea.vmem %s27_s25, 2048  ;;  %p624_p4 = scmp.lt.s32.totalorder %s27_s25, %s27_s25 }
   0xb   :  { %p620_p3 = scmp.ne.s32.totalorder %s27_s25, %s619_s10  ;;  %p625_p5 = scmp.lt.s32.totalorder %s619_s10, %s619_s10 }
   0xd   :  { %p626_p6 = por %p625_p5, %p624_p4 }
   0xf   :  { %p627_p7 = pnand %p626_p6, %p620_p3 }
  0x11   :  { %630 = shalt.err (!%p627_p7)
}
  0x12   :  { %s706_s11 = smov 128   ;;  %s707_s12 = smov 8  }
  0x13   :  { %32 = dma.hbm_to_vmem [thread:$0]  %s839_s2, 2048, %s27_s25, [#allocation4], %s706_s11, %s706_s11, %s707_s12  }
  0x14   :  { %s708_s15 = smov [#allocation6]   ;;  %s631_s19 = scalar_lea.hbm %s841_s4, 4096 }
  0x15   :  { %s40_s16 = sshll.u32 %s708_s15, 4  ;;  %p632_p8 = scmp.ne.s32.totalorder %s841_s4, %s631_s19  ;;  %s41_s16 = int_to_ptr.vmem [resolvable:$true] %s40_s16 }
  0x16   :  { %p635_p9 = scmp.lt.u32.totalorder %s631_s19, %s841_s4 }
  0x18   :  { %p637_p10 = pnand %p635_p9, %p632_p8 }
  0x1a   :  { %640 = shalt.err (!%p637_p10)
}
  0x1b   :  { %s641_s24 = scalar_lea.vmem %s41_s16, 4096  ;;  %p646_p12 = scmp.lt.s32.totalorder %s41_s16, %s41_s16 }
  0x1c   :  { %p642_p11 = scmp.ne.s32.totalorder %s41_s16, %s641_s24  ;;  %p647_p13 = scmp.lt.s32.totalorder %s641_s24, %s641_s24 }
  0x1e   :  { %p648_p0 = por %p647_p13, %p646_p12 }
  0x20   :  { %p649_p1 = pnand %p648_p0, %p642_p11 }
  0x22   :  { %652 = shalt.err (!%p649_p1)
}
  0x23   :  { %s709_s2 = smov 256   ;;  %s710_s25 = smov 16  }
  0x24   :  { %46 = dma.hbm_to_vmem [thread:$0]  %s841_s4, 4096, %s41_s16, [#allocation7], %s709_s2, %s709_s2, %s710_s25  }
  0x25   :  { %697 = dma.done.wait [#allocation4], 2048  }
  0x26   :  { %698 = vsyncadd [#allocation4], 4294965248 }
  0x27   :  { %699 = dma.done.wait [#allocation7], 4096  }
  0x28   :  { %700 = vsyncadd [#allocation7], 4294963200  ;;  %v711_v0 = vmov 0.0|0.0   ;;  %v712_v1 = vmov 0.0   ;;  %vm713_vm0 = vmmov 0   ;;  %v158_v2 = vld [vmem:[#allocation6 + $0x8] sm:$0xff] }
  0x29   :  { %538 = vmatprep.subr.bf16.mxu0 %v711_v0  ;;  %265 = vmatprep.mubr.f32.mxu1 %v712_v1  ;;  %v160_v3 = vld [vmem:[#allocation6 + $0x18] sm:$0xff]  ;;  %v157_v4 = vld [vmem:[#allocation6] sm:$0xff]  ;;  %v159_v6 = vld [vmem:[#allocation6 + $0x10] sm:$0xff]  ;;  %vm343_vm1 = vcmask 64512  }
  0x2a   :  { %525 = vmatprep.mubr.msk.f32.mxu0 %vm713_vm0, %v712_v1  ;;  %v562_v5 = vpack.c.bf16 %v160_v3, %v158_v2  ;;  %v60_v7 = vld [vmem:[#allocation3] sm:$0xff]  ;;  %v61_v8 = vld [vmem:[#allocation3 + $0x8] sm:$0xff]  ;;  %v564_v9 = vpack.c.bf16 %v159_v6, %v157_v4  ;;  %v164_v12 = vld [vmem:[#allocation6 + $0x38] sm:$0xff] }
  0x2b   :  { %v539_v10 = vpack.c.bf16 %v61_v8, %v60_v7  ;;  %v162_v11 = vld [vmem:[#allocation6 + $0x28] sm:$0xff]  ;;  %v161_v13 = vld [vmem:[#allocation6 + $0x20] sm:$0xff]  ;;  %v163_v15 = vld [vmem:[#allocation6 + $0x30] sm:$0xff] }
  0x2c   :  { %563 = vmatprep.subr.bf16.mxu1 %v562_v5  ;;  %v566_v14 = vpack.c.bf16 %v164_v12, %v162_v11  ;;  %v62_v16 = vld [vmem:[#allocation3 + $0x10] sm:$0xff]  ;;  %v63_v17 = vld [vmem:[#allocation3 + $0x18] sm:$0xff]  ;;  %v568_v18 = vpack.c.bf16 %v163_v15, %v161_v13  ;;  %v166_v20 = vld [vmem:[#allocation6 + $0x48] sm:$0xff] }
  0x2d   :  { %565 = vmatpush1.bf16.msra.mxu1 %v564_v9  ;;  %540 = vmatpush3.bf16.msra.mxu0 %v539_v10  ;;  %v542_v19 = vpack.c.bf16 %v63_v17, %v62_v16  ;;  %v168_v21 = vld [vmem:[#allocation6 + $0x58] sm:$0xff]  ;;  %v165_v22 = vld [vmem:[#allocation6 + $0x40] sm:$0xff]  ;;  %v167_v24 = vld [vmem:[#allocation6 + $0x50] sm:$0xff] }
  0x2e   :  { %567 = vmatprep.subr.bf16.mxu1 %v566_v14  ;;  %541 = vmatprep.subr.bf16.mxu0 %v711_v0  ;;  %v570_v23 = vpack.c.bf16 %v168_v21, %v166_v20  ;;  %v64_v25 = vld [vmem:[#allocation3 + $0x20] sm:$0xff]  ;;  %v65_v26 = vld [vmem:[#allocation3 + $0x28] sm:$0xff]  ;;  %v172_v28 = vld [vmem:[#allocation6 + $0x78] sm:$0xff]  ;;  %v572_v29 = vpack.c.bf16 %v167_v24, %v165_v22 }
  0x2f   :  { %v170_v27 = vld [vmem:[#allocation6 + $0x68] sm:$0xff]  ;;  %v545_v30 = vpack.c.bf16 %v65_v26, %v64_v25  ;;  %v169_v31 = vld [vmem:[#allocation6 + $0x60] sm:$0xff]  ;;  %v171_v33 = vld [vmem:[#allocation6 + $0x70] sm:$0xff] }
  0x30   :  { %v574_v32 = vpack.c.bf16 %v172_v28, %v170_v27  ;;  %v66_v34 = vld [vmem:[#allocation3 + $0x30] sm:$0xff]  ;;  %v67_v35 = vld [vmem:[#allocation3 + $0x38] sm:$0xff]  ;;  %v174_v36 = vld [vmem:[#allocation6 + $0x88] sm:$0xff]  ;;  %v576_v38 = vpack.c.bf16 %v171_v33, %v169_v31 }
  0x31   :  { %569 = vmatpush1.bf16.msra.mxu1 %v568_v18  ;;  %543 = vmatpush3.bf16.msra.mxu0 %v542_v19  ;;  %v176_v37 = vld [vmem:[#allocation6 + $0x98] sm:$0xff]  ;;  %v548_v39 = vpack.c.bf16 %v67_v35, %v66_v34  ;;  %v173_v40 = vld [vmem:[#allocation6 + $0x80] sm:$0xff]  ;;  %v175_v42 = vld [vmem:[#allocation6 + $0x90] sm:$0xff] }
  0x32   :  { %571 = vmatprep.subr.bf16.mxu1 %v570_v23  ;;  %544 = vmatprep.subr.bf16.mxu0 %v711_v0  ;;  %v578_v41 = vpack.c.bf16 %v176_v37, %v174_v36  ;;  %v68_v43 = vld [vmem:[#allocation3 + $0x40] sm:$0xff]  ;;  %v69_v44 = vld [vmem:[#allocation3 + $0x48] sm:$0xff]  ;;  %v180_v46 = vld [vmem:[#allocation6 + $0xb8] sm:$0xff]  ;;  %v580_v47 = vpack.c.bf16 %v175_v42, %v173_v40 }
  0x33   :  { %v178_v45 = vld [vmem:[#allocation6 + $0xa8] sm:$0xff]  ;;  %v551_v48 = vpack.c.bf16 %v69_v44, %v68_v43  ;;  %v177_v49 = vld [vmem:[#allocation6 + $0xa0] sm:$0xff]  ;;  %v179_v51 = vld [vmem:[#allocation6 + $0xb0] sm:$0xff] }
  0x34   :  { %v582_v50 = vpack.c.bf16 %v180_v46, %v178_v45  ;;  %v70_v52 = vld [vmem:[#allocation3 + $0x50] sm:$0xff]  ;;  %v71_v53 = vld [vmem:[#allocation3 + $0x58] sm:$0xff]  ;;  %v182_v54 = vld [vmem:[#allocation6 + $0xc8] sm:$0xff]  ;;  %v584_v56 = vpack.c.bf16 %v179_v51, %v177_v49 }
  0x35   :  { %573 = vmatpush1.bf16.msra.mxu1 %v572_v29  ;;  %546 = vmatpush3.bf16.msra.mxu0 %v545_v30  ;;  %v184_v55 = vld [vmem:[#allocation6 + $0xd8] sm:$0xff]  ;;  %v554_v57 = vpack.c.bf16 %v71_v53, %v70_v52  ;;  %v181_v58 = vld [vmem:[#allocation6 + $0xc0] sm:$0xff]  ;;  %v183_v60 = vld [vmem:[#allocation6 + $0xd0] sm:$0xff] }
  0x36   :  { %575 = vmatprep.subr.bf16.mxu1 %v574_v32  ;;  %547 = vmatprep.subr.bf16.mxu0 %v711_v0  ;;  %v586_v59 = vpack.c.bf16 %v184_v55, %v182_v54  ;;  %v72_v61 = vld [vmem:[#allocation3 + $0x60] sm:$0xff]  ;;  %v73_v62 = vld [vmem:[#allocation3 + $0x68] sm:$0xff]  ;;  %v188_v2 = vld [vmem:[#allocation6 + $0xf8] sm:$0xff]  ;;  %v588_v3 = vpack.c.bf16 %v183_v60, %v181_v58 }
  0x37   :  { %v186_v63 = vld [vmem:[#allocation6 + $0xe8] sm:$0xff]  ;;  %v557_v4 = vpack.c.bf16 %v73_v62, %v72_v61  ;;  %v185_v5 = vld [vmem:[#allocation6 + $0xe0] sm:$0xff]  ;;  %v187_v7 = vld [vmem:[#allocation6 + $0xf0] sm:$0xff] }
  0x38   :  { %v590_v6 = vpack.c.bf16 %v188_v2, %v186_v63  ;;  %v74_v8 = vld [vmem:[#allocation3 + $0x70] sm:$0xff]  ;;  %v75_v9 = vld [vmem:[#allocation3 + $0x78] sm:$0xff]  ;;  %v592_v10 = vpack.c.bf16 %v187_v7, %v185_v5  ;;  %v156_v12 = vld [vmem:[%s838_s1] sm:$0xff] }
  0x39   :  { %577 = vmatpush1.bf16.msra.mxu1 %v576_v38  ;;  %549 = vmatpush3.bf16.msra.mxu0 %v548_v39  ;;  %v560_v11 = vpack.c.bf16 %v75_v9, %v74_v8  ;;  %v59_v13 = vld [vmem:[%s837_s0] sm:$0xff] }
  0x3a   :  { %579 = vmatprep.subr.bf16.mxu1 %v578_v41  ;;  %550 = vmatprep.subr.bf16.mxu0 %v711_v0  ;;  %v189_v16 = vld [vmem:[%s842_s5] sm:$0x3] }
  0x3b   :  { %v470_v19 = vld [vmem:[%s840_s3] ss:$0 sm:$0xff]  ;;  %s714_s3 = smov [#allocation9]  }
  0x3c   :  { %s456_s5 = sshll.u32 %s714_s3, 4  ;;  %s457_s5 = int_to_ptr.vmem [resolvable:$true] %s456_s5 }
  0x3d   :  { %581 = vmatpush1.bf16.msra.mxu1 %v580_v47  ;;  %552 = vmatpush3.bf16.msra.mxu0 %v551_v48  ;;  %s653_s10 = scalar_lea.vmem %s457_s5, 128  ;;  %p658_p3 = scmp.lt.s32.totalorder %s457_s5, %s457_s5 }
  0x3e   :  { %583 = vmatprep.subr.bf16.mxu1 %v582_v50  ;;  %553 = vmatprep.subr.bf16.mxu0 %v711_v0  ;;  %p654_p2 = scmp.ne.s32.totalorder %s457_s5, %s653_s10  ;;  %p659_p4 = scmp.lt.s32.totalorder %s653_s10, %s653_s10 }
  0x40   :  { %p660_p5 = por %p659_p4, %p658_p3 }
  0x41   :  { %585 = vmatpush1.bf16.msra.mxu1 %v584_v56  ;;  %555 = vmatpush3.bf16.msra.mxu0 %v554_v57 }
  0x42   :  { %587 = vmatprep.subr.bf16.mxu1 %v586_v59  ;;  %556 = vmatprep.subr.bf16.mxu0 %v711_v0  ;;  %p661_p6 = pnand %p660_p5, %p654_p2 }
  0x45   :  { %589 = vmatpush1.bf16.msra.mxu1 %v588_v3  ;;  %558 = vmatpush3.bf16.msra.mxu0 %v557_v4 }
  0x46   :  { %591 = vmatprep.subr.bf16.mxu1 %v590_v6  ;;  %559 = vmatprep.subr.bf16.mxu0 %v711_v0  ;;  %v191_v0 = vlaneseq }
  0x48   :  { %v192_v14 = vshrl.u32 %v191_v0, 7 }
  0x49   :  { %593 = vmatpush1.bf16.msra.mxu1 %v592_v10  ;;  %561 = vmatpush3.bf16.msra.mxu0 %v560_v11 }
  0x4a   :  { %528 = vmatprep.subr.mxu0 %v712_v1  ;;  %533 = vmatprep.subr.mxu1 %v712_v1  ;;  %v193_v15 = vsub.s32 0, %v192_v14  ;;  %v197_v17 = vsub.s32 1, %v192_v14 }
  0x4c   :  { %266 = vmatmul.mubr.f32.vlgmr.msra.gmra.mrb[0].mxu1 %v156_v12  ;;  %526 = vmatmul.mubr.f32.vlgmr.msra.gmra.mrb[0].mxu0 %v59_v13  ;;  %v194_v18 = vrot.slane %v189_v16, %v193_v15  ;;  %v198_v20 = vrot.slane %v189_v16, %v197_v17 }
  0x4d   :  { %530 = vmatprep.mubr.msk.f32.mxu0 %vm713_vm0, %v712_v1  ;;  %535 = vmatprep.mubr.msk.f32.mxu1 %vm713_vm0, %v712_v1 }
 0x11f   :  { %v267_v21 = vpop.f32.mrb[0].mxu1  ;;  %v149_v22 = vpop.f32.mrb[0].mxu0 }
 0x120   :  { %v268_v23 = vadd.f32 %v267_v21, %v194_v18  ;;  %v150_v24 = vadd.f32 %v470_v19, %v149_v22  ;;  %v269_v25 = vpop.f32.mrb[1].mxu1  ;;  %v527_v1 = vpop.f32.mrb[1].mxu0 }
 0x121   :  { %v270_v26 = vadd.f32 %v269_v25, %v198_v20 }
 0x122   :  { %v153_v27 = vmul.f32 0.17677669, %v150_v24  ;;  %529 = vmatpush3.xpose.msra.mxu0 %v268_v23 }
 0x123   :  { %534 = vmatpush3.msra.mxu1 %v270_v26 }
 0x125   :  { %531 = vmatmul.mubr.f32.vlgmr.msra.gmra.mrb[2].mxu0 %v153_v27 }
 0x1f8   :  { %v339_v28 = vpop.f32.mrb[2].mxu0 }
 0x1f9   :  { %v344_v29 = vsel %vm343_vm1, %v339_v28, -inf  ;;  %v532_v30 = vpop.f32.mrb[3].mxu0 }
 0x1fa   :  { %v345_v31 = vrot.slane %v344_v29, 4 }
 0x1fc   :  { %v346_v32 = vmax.f32 %v344_v29, %v345_v31 }
 0x1fe   :  { %v347_v33 = vrot.slane %v346_v32, 2 }
 0x200   :  { %v348_v34 = vmax.f32 %v346_v32, %v347_v33 }
 0x202   :  { %v349_v35 = vrot.slane %v348_v34, 1 }
 0x204   :  { %v350_v36 = vmax.f32 %v348_v34, %v349_v35 }
 0x206   :  { %v351_v37 = vsub.f32 %v339_v28, %v350_v36 }
 0x208   :  { %v352_v38 = vmul.f32 1.442695, %v351_v37 }
 0x20a   :  { %605 = vpow2.f32 %v352_v38 }
 0x214   :  { %v606_v39 = vpop.eup %605 }
 0x215   :  { %v354_v40 = vsel %vm343_vm1, %v606_v39, 0.0 }
 0x216   :  { %v355_v41 = vrot.slane %v354_v40, 4 }
 0x218   :  { %v356_v42 = vadd.f32 %v355_v41, %v354_v40 }
 0x21a   :  { %v357_v43 = vrot.slane %v356_v42, 2 }
 0x21c   :  { %v358_v44 = vadd.f32 %v357_v43, %v356_v42 }
 0x21e   :  { %v359_v45 = vrot.slane %v358_v44, 1 }
 0x220   :  { %v360_v46 = vadd.f32 %v359_v45, %v358_v44 }
 0x222   :  { %607 = vrcp.f32 %v360_v46 }
 0x22c   :  { %v608_v47 = vpop.eup %607 }
 0x22d   :  { %v362_v48 = vmul.f32 %v608_v47, %v606_v39 }
 0x22f   :  { %536 = vmatmul.mubr.msk.f32.vlgmr.msra.gmra.mrb[2].mxu1 %vm343_vm1, %v362_v48  ;;  %363 = vst.msk [vmem:[#allocation9] sm:$0xff] %vm343_vm1, %v362_v48 }
 0x230   :  { %664 = shalt.err (!%p661_p6)
}
 0x231   :  { %s665_s13 = scalar_lea.hbm %s844_s7, 128 }
 0x232   :  { %p666_p7 = scmp.ne.s32.totalorder %s844_s7, %s665_s13  ;;  %p669_p8 = scmp.lt.u32.totalorder %s665_s13, %s844_s7 }
 0x234   :  { %p671_p9 = pnand %p669_p8, %p666_p7 }
 0x236   :  { %674 = shalt.err (!%p671_p9)
}
 0x237   :  { %459 = dma.vmem_to_hbm [thread:$0]  %s457_s5, 128, %s844_s7, [#allocation10]  }
 0x238   :  { %s715_s20 = smov [#allocation8]  }
 0x239   :  { %s446_s21 = sshll.u32 %s715_s20, 4  ;;  %s447_s21 = int_to_ptr.vmem [resolvable:$true] %s446_s21 }
 0x23a   :  { %s675_s22 = scalar_lea.vmem %s447_s21, 128  ;;  %p680_p11 = scmp.lt.s32.totalorder %s447_s21, %s447_s21 }
 0x23b   :  { %p676_p10 = scmp.ne.s32.totalorder %s447_s21, %s675_s22  ;;  %p681_p12 = scmp.lt.s32.totalorder %s675_s22, %s675_s22 }
 0x23d   :  { %p682_p13 = por %p681_p12, %p680_p11 }
 0x23f   :  { %p683_p0 = pnand %p682_p13, %p676_p10 }
 0x302   :  { %v434_v49 = vpop.f32.mrb[2].mxu1 }
 0x303   :  { %v537_v50 = vpop.f32.mrb[3].mxu1  ;;  %439 = vst [vmem:[#allocation8] sm:$0xff] %v434_v49 }
 0x304   :  { %686 = shalt.err (!%p683_p0)
}
 0x305   :  { %s687_s2 = scalar_lea.hbm %s843_s6, 128 }
 0x306   :  { %p688_p1 = scmp.ne.s32.totalorder %s843_s6, %s687_s2  ;;  %p691_p2 = scmp.lt.u32.totalorder %s687_s2, %s843_s6 }
 0x308   :  { %p693_p3 = pnand %p691_p2, %p688_p1 }
 0x30a   :  { %696 = shalt.err (!%p693_p3)
}
 0x30b   :  { %449 = dma.vmem_to_hbm [thread:$0]  %s447_s21, 128, %s843_s6, [#allocation5]  }
 0x30c   :  { %701 = dma.done.wait [#allocation5], 128  }
 0x30d   :  { %702 = vsyncadd [#allocation5], 4294967168 }
 0x30e   :  { %703 = dma.done.wait [#allocation10], 128  }
 0x30f   :  { %704 = vsyncadd [#allocation10], 4294967168 }
 0x310   :  { %466 = vsyncpa [#allocation4], 1 }
 0x311   :  { %467 = vsyncpa [#allocation7], 1 }
 0x312   :  { %468 = vsyncpa [#allocation5], 1 }
 0x313   :  { %469 = vsyncpa [#allocation10], 1 }

</bundles_post_ra>
